<compile_context>
chip_gen: v7x
topology: tpu7x:2x2x1
jax: 0.10.0
libtpu: 0.0.40
codegen_flags: <defaults>
</compile_context>

<pallas_src>
import jax
import jax.numpy as jnp
from jax.experimental import pallas as pl
from jax.experimental.pallas import tpu as pltpu


def _round_up(x, m):
    return ((x + m - 1) // m) * m


def _cdiv(a, b):
    return -(-a // b)


# ---------------------------------------------------------------------------
# Kernel bodies
# ---------------------------------------------------------------------------
def _linear_kernel_single_k(x_ref, w_ref, b_ref, o_ref):
    # Fast path: whole K strip in one tile.  x_ref (tm, Kp) bf16, w_ref (Kp, tn) bf16,
    # b_ref (1, tn) f32, o_ref (tm, tn).
    acc = jnp.dot(x_ref[...], w_ref[...], preferred_element_type=jnp.float32)
    o_ref[...] = (acc + b_ref[...].astype(jnp.float32)).astype(o_ref.dtype)


def _linear_kernel_acc(x_ref, w_ref, b_ref, o_ref, acc_ref):
    # Reduction path: grid=(Mblk, Nblk, Kblk), K innermost ("arbitrary").
    k = pl.program_id(2)

    @pl.when(k == 0)
    def _():
        # Fold the bias into the accumulator init (saves a tile-wide VPU add in the epilogue).
        acc_ref[...] = jnp.broadcast_to(
            b_ref[...].astype(jnp.float32), acc_ref.shape
        )

    acc_ref[...] += jnp.dot(
        x_ref[...], w_ref[...], preferred_element_type=jnp.float32
    )

    @pl.when(k == pl.num_programs(2) - 1)
    def _():
        o_ref[...] = acc_ref[...].astype(o_ref.dtype)


# ---------------------------------------------------------------------------
# Wrapper
# ---------------------------------------------------------------------------
def conv1d(
    x,
    w,
    b,
    *,
    tm=512,
    tn=512,
    tk=1024,
    compute_dtype=jnp.bfloat16,
    single_k_budget_bytes=24 * 1024 * 1024,
    vmem_limit_bytes=48 * 1024 * 1024,
):
    """GPT-2 Conv1D forward: x [..., nx], w [nx, nf], b [nf] -> [..., nf]."""
    orig_shape = x.shape
    out_dtype = x.dtype
    nx = orig_shape[-1]
    nf = w.shape[1]
    x2 = x.reshape(-1, nx)
    M, K, N = x2.shape[0], nx, nf

    in_bytes = jnp.dtype(compute_dtype).itemsize
    out_bytes = jnp.dtype(out_dtype).itemsize

    # ---- tile selection ---------------------------------------------------
    # bf16 operands want (16, 128)-aligned tiles; keep tn lane-dense / MXU-shaped (256 multiple).
    tm = min(tm, _round_up(M, 16))
    tn = min(tn, _round_up(N, 256))

    # v7x has 2 TensorCores sharded over the 'parallel' (M, N) grid axes: if both parallel axes
    # collapsed to a single block, split N so at least 2 parallel blocks exist (no-op on v5e/v6e).
    np_hint = _round_up(N, 256)
    if _cdiv(M, tm) == 1 and _cdiv(np_hint, tn) == 1 and N > 256:
        tn = _round_up(_cdiv(np_hint, 2), 256)

    # No-K-loop fast path: put the whole (128-padded) K strip in one tile when the
    # double-buffered inputs + output tile fit a modest VMEM budget.
    kp128 = _round_up(K, 128)
    single_k_bytes = 2 * kp128 * (tm + tn) * in_bytes + 2 * tm * tn * out_bytes
    if single_k_bytes <= single_k_budget_bytes:
        tk = kp128
        Kp = kp128
    else:
        tk = min(tk, kp128)
        Kp = _round_up(K, tk)

    Mp, Np = _round_up(M, tm), _round_up(N, tn)

    # ---- operand prep (cast to compute dtype; pad only when needed) -------
    x_c = x2.astype(compute_dtype)
    w_c = w.astype(compute_dtype)
    if (Mp, Kp) != (M, K):
        x_c = jnp.pad(x_c, ((0, Mp - M), (0, Kp - K)))
    if (Kp, Np) != (K, N):
        w_c = jnp.pad(w_c, ((0, Kp - K), (0, Np - N)))
    b2 = b.reshape(1, N)
    if Np != N:
        b2 = jnp.pad(b2, ((0, 0), (0, Np - N)))

    grid_i, grid_j, grid_k = Mp // tm, Np // tn, Kp // tk

    cost = pl.CostEstimate(
        flops=2 * M * N * K,
        bytes_accessed=(M * K + K * N) * in_bytes + M * N * out_bytes,
        transcendentals=0,
    )

    if grid_k == 1:
        kernel = _linear_kernel_single_k
        grid = (grid_i, grid_j)
        in_specs = [
            pl.BlockSpec((tm, tk), lambda i, j: (i, 0)),
            pl.BlockSpec((tk, tn), lambda i, j: (0, j)),
            pl.BlockSpec((1, tn), lambda i, j: (0, j)),
        ]
        out_specs = pl.BlockSpec((tm, tn), lambda i, j: (i, j))
        scratch_shapes = []
        dim_sem = ("parallel", "parallel")
    else:
        kernel = _linear_kernel_acc
        grid = (grid_i, grid_j, grid_k)
        in_specs = [
            pl.BlockSpec((tm, tk), lambda i, j, k: (i, k)),
            pl.BlockSpec((tk, tn), lambda i, j, k: (k, j)),
            pl.BlockSpec((1, tn), lambda i, j, k: (0, j)),
        ]
        out_specs = pl.BlockSpec((tm, tn), lambda i, j, k: (i, j))
        scratch_shapes = [pltpu.VMEM((tm, tn), jnp.float32)]
        dim_sem = ("parallel", "parallel", "arbitrary")

    out_p = pl.pallas_call(
        kernel,
        out_shape=jax.ShapeDtypeStruct((Mp, Np), out_dtype),
        grid_spec=pltpu.PrefetchScalarGridSpec(
            num_scalar_prefetch=0,
            grid=grid,
            in_specs=in_specs,
            out_specs=out_specs,
            scratch_shapes=scratch_shapes,
        ),
        compiler_params=pltpu.CompilerParams(
            dimension_semantics=dim_sem,
            vmem_limit_bytes=vmem_limit_bytes,
        ),
        cost_estimate=cost,
    )(x_c, w_c, b2)

    out = out_p
    if (Mp, Np) != (M, N):
        out = out[:M, :N]
    return out.reshape(orig_shape[:-1] + (nf,))


# ---------------------------------------------------------------------------
# Parameter init matching the PyTorch module (normal std=0.02 weight, zero bias).
# ---------------------------------------------------------------------------
def init_conv1d_params(key, nx, nf):
    return {
        "weight": (0.02 * jax.random.normal(key, (nx, nf))).astype(jnp.float32),
        "bias": jnp.zeros((nf,), jnp.float32),
    }


def _reference_forward(x, params):
    nx = x.shape[-1]
    nf = params["weight"].shape[1]
    y = x.reshape(-1, nx) @ params["weight"] + params["bias"]
    return y.reshape(x.shape[:-1] + (nf,))


if __name__ == "__main__":
    key = jax.random.PRNGKey(0)

    # --- case 1: small GPT-2-like shape, exercises the no-K-loop fast path ---
    batch, seq, nx, nf = 2, 8, 32, 64
    kp, kx, key = jax.random.split(key, 3)
    params = init_conv1d_params(kp, nx, nf)
    x = jax.random.normal(kx, (batch, seq, nx), dtype=jnp.float32)

    out = conv1d(x, params["weight"], params["bias"])
    out = jax.block_until_ready(out)
    ref = _reference_forward(x, params)
    assert out.shape == (batch, seq, nf)
    # bf16 operands / f32 accumulation -> bf16-level tolerance vs the f32 reference.
    assert jnp.allclose(out, ref, atol=2e-2, rtol=2e-2)

    # --- case 2: force the K-reduction (accumulator) path at small shapes ---
    batch2, seq2, nx2, nf2 = 2, 8, 256, 128
    kp2, kx2, key = jax.random.split(key, 3)
    params2 = init_conv1d_params(kp2, nx2, nf2)
    x2 = jax.random.normal(kx2, (batch2, seq2, nx2), dtype=jnp.float32)

    out2 = conv1d(
        x2, params2["weight"], params2["bias"], tk=128, single_k_budget_bytes=0
    )
    out2 = jax.block_until_ready(out2)
    ref2 = _reference_forward(x2, params2)
    assert out2.shape == (batch2, seq2, nf2)
    assert jnp.allclose(out2, ref2, atol=2e-2, rtol=2e-2)

    print("KERNEL_OK")
</pallas_src>

<mosaic_0001>
module attributes {stable_mosaic.version = 11 : i64} {
  func.func @_linear_kernel_single_k(%arg0: i32, %arg1: i32, %arg2: memref<16x128xbf16, #tpu.memory_space<vmem>>, %arg3: memref<128x256xbf16, #tpu.memory_space<vmem>>, %arg4: memref<1x256xf32, #tpu.memory_space<vmem>>, %arg5: memref<16x256xf32, #tpu.memory_space<vmem>>) attributes {dimension_semantics = [#tpu.dimension_semantics<parallel>, #tpu.dimension_semantics<parallel>], iteration_bounds = array<i64: 1, 1>, scalar_prefetch = 0 : i64, scratch_operands = 0 : i64, tpu.core_type = #tpu.core_type<tc>, window_params = [{transform_indices = @transform_0, window_bounds = array<i64: 16, 128>}, {transform_indices = @transform_1, window_bounds = array<i64: 128, 256>}, {transform_indices = @transform_2, window_bounds = array<i64: 1, 256>}, {transform_indices = @transform_3, window_bounds = array<i64: 16, 256>}]} {
    %c0 = arith.constant 0 : index
    %c0_0 = arith.constant 0 : index
    %0 = vector.load %arg2[%c0, %c0_0] : memref<16x128xbf16, #tpu.memory_space<vmem>>, vector<16x128xbf16>
    %c0_1 = arith.constant 0 : index
    %c0_2 = arith.constant 0 : index
    %1 = vector.load %arg3[%c0_1, %c0_2] : memref<128x256xbf16, #tpu.memory_space<vmem>>, vector<128x256xbf16>
    %cst = arith.constant dense<0.000000e+00> : vector<16x256xf32>
    %2 = tpu.matmul %0, %1, %cst {dimension_numbers = #tpu.dot_dimension_numbers<[1], [0], [0], [1], [0, 0, 1, 1], [], []>} : vector<16x128xbf16>, vector<128x256xbf16>, vector<16x256xf32> -> vector<16x256xf32>
    %c0_3 = arith.constant 0 : index
    %c0_4 = arith.constant 0 : index
    %3 = vector.load %arg4[%c0_3, %c0_4] : memref<1x256xf32, #tpu.memory_space<vmem>>, vector<1x256xf32>
    %4 = vector.broadcast %3 : vector<1x256xf32> to vector<16x256xf32>
    %5 = arith.addf %2, %4 : vector<16x256xf32>
    %c0_5 = arith.constant 0 : index
    %c0_6 = arith.constant 0 : index
    %6 = vector.load %arg5[%c0_5, %c0_6] : memref<16x256xf32, #tpu.memory_space<vmem>>, vector<16x256xf32>
    tpu.vector_store %arg5[%c0_5, %c0_6], %5 {strides = array<i32>} : memref<16x256xf32, #tpu.memory_space<vmem>>, vector<16x256xf32>,
    return
  }
  func.func @transform_0(%arg0: i32, %arg1: i32) -> (i32, i32) {
    %c0_i32 = arith.constant 0 : i32
    %c0_i32_0 = arith.constant 0 : i32
    return %arg0, %c0_i32 : i32, i32
  }
  func.func @transform_1(%arg0: i32, %arg1: i32) -> (i32, i32) {
    %c0_i32 = arith.constant 0 : i32
    %c0_i32_0 = arith.constant 0 : i32
    return %c0_i32, %arg1 : i32, i32
  }
  func.func @transform_2(%arg0: i32, %arg1: i32) -> (i32, i32) {
    %c0_i32 = arith.constant 0 : i32
    %c0_i32_0 = arith.constant 0 : i32
    return %c0_i32, %arg1 : i32, i32
  }
  func.func @transform_3(%arg0: i32, %arg1: i32) -> (i32, i32) {
    %c0_i32 = arith.constant 0 : i32
    return %arg0, %arg1 : i32, i32
  }
}

</mosaic_0001>

<bundles_post_ra>
// kernel: tpu_custom_call.1
= control target key start
LH: loop header
LB: loop body
LE: loop exit
PB: predicated region body
PF: predicated region fallthrough
CT: control target
= control target key end

     0   :  { %8 = vsyncpa [#allocation3], 0  ;;  %s418_s0 = inlined_call_operand.hbm [shape: bf16[16,128], index: 0, kind: input, shape index: {}]   ;;  %s419_s1 = inlined_call_operand.hbm [shape: bf16[128,256], index: 1, kind: input, shape index: {}]   ;;  %s420_s2 = inlined_call_operand.vmem [shape: f32[1,256], index: 2, kind: input, shape index: {}]   ;;  %s421_s3 = inlined_call_operand.hbm [shape: f32[16,256], index: 3, kind: output, shape index: {}]  }
   0x1   :  { %9 = vsyncpa [#allocation6], 0 }
   0x2   :  { %10 = vsyncpa [#allocation4], 0  ;;  %s349_s12 = smov [#allocation2]   ;;  %s277_s16 = scalar_lea.hbm %s418_s0, 128 }
   0x3   :  { %s16_s13 = sshll.u32 %s349_s12, 4  ;;  %p278_p0 = scmp.ne.s32.totalorder %s418_s0, %s277_s16  ;;  %s17_s13 = int_to_ptr.vmem [resolvable:$true] %s16_s13 }
   0x4   :  { %p281_p1 = scmp.lt.u32.totalorder %s277_s16, %s418_s0 }
   0x6   :  { %p283_p2 = pnand %p281_p1, %p278_p0 }
   0x8   :  { %286 = shalt.err (!%p283_p2)
}
   0x9   :  { %s287_s21 = scalar_lea.vmem %s17_s13, 128  ;;  %p292_p4 = scmp.lt.s32.totalorder %s17_s13, %s17_s13 }
   0xa   :  { %p288_p3 = scmp.ne.s32.totalorder %s17_s13, %s287_s21  ;;  %p293_p5 = scmp.lt.s32.totalorder %s287_s21, %s287_s21 }
   0xc   :  { %p294_p6 = por %p293_p5, %p292_p4 }
   0xe   :  { %p295_p7 = pnand %p294_p6, %p288_p3 }
  0x10   :  { %298 = shalt.err (!%p295_p7)
}
  0x11   :  { %s350_s22 = smov 64   ;;  %s351_s23 = smov 4  }
  0x12   :  { %22 = dma.hbm_to_vmem [thread:$0]  %s418_s0, 128, %s17_s13, [#allocation3], %s350_s22, %s350_s22, %s351_s23  }
  0x13   :  { %s352_s26 = smov [#allocation5]   ;;  %s299_s30 = scalar_lea.hbm %s419_s1, 2048 }
  0x14   :  { %s28_s27 = sshll.u32 %s352_s26, 4  ;;  %p300_p8 = scmp.ne.s32.totalorder %s419_s1, %s299_s30  ;;  %s29_s27 = int_to_ptr.vmem [resolvable:$true] %s28_s27 }
  0x15   :  { %p303_p9 = scmp.lt.u32.totalorder %s299_s30, %s419_s1 }
  0x17   :  { %p305_p10 = pnand %p303_p9, %p300_p8 }
  0x19   :  { %308 = shalt.err (!%p305_p10)
}
  0x1a   :  { %s309_s8 = scalar_lea.vmem %s29_s27, 2048  ;;  %p314_p12 = scmp.lt.s32.totalorder %s29_s27, %s29_s27 }
  0x1b   :  { %p310_p11 = scmp.ne.s32.totalorder %s29_s27, %s309_s8  ;;  %p315_p13 = scmp.lt.s32.totalorder %s309_s8, %s309_s8 }
  0x1d   :  { %p316_p0 = por %p315_p13, %p314_p12 }
  0x1f   :  { %p317_p1 = pnand %p316_p0, %p310_p11 }
  0x21   :  { %320 = shalt.err (!%p317_p1)
}
  0x22   :  { %s353_s0 = smov 128   ;;  %s354_s9 = smov 8  }
  0x23   :  { %34 = dma.hbm_to_vmem [thread:$0]  %s419_s1, 2048, %s29_s27, [#allocation6], %s353_s0, %s353_s0, %s354_s9  }
  0x24   :  { %343 = dma.done.wait [#allocation3], 128  }
  0x25   :  { %344 = vsyncadd [#allocation3], 4294967168 }
  0x26   :  { %345 = dma.done.wait [#allocation6], 2048  }
  0x27   :  { %346 = vsyncadd [#allocation6], 4294965248  ;;  %v355_v0 = vmov 0   ;;  %v252_v1 = vld [vmem:[#allocation5 + $0x4] ss:$8 sps:$4 sm:$0xff]   ;;  %v276_v17 = vld [vmem:[#allocation2] sm:$0xff]   ;;  %v64_v18 = vlaneseq }
  0x28   :  { %192 = vmatprep.mubr.bf16.mxu0 %v355_v0  ;;  %v254_v2 = vld [vmem:[#allocation5] ss:$8 sps:$4 sm:$0xff]   ;;  %160 = vmatprep.subr.bf16.mxu0 %v252_v1  ;;  %v255_v3 = vld [vmem:[#allocation5 + $0x14] ss:$8 sps:$4 sm:$0xff]   ;;  %v257_v4 = vld [vmem:[#allocation5 + $0x10] ss:$8 sps:$4 sm:$0xff]  }
  0x29   :  { %161 = vmatpush1.bf16.msra.mxu0 %v254_v2  ;;  %v258_v5 = vld [vmem:[#allocation5 + $0x24] ss:$8 sps:$4 sm:$0xff]   ;;  %v260_v6 = vld [vmem:[#allocation5 + $0x20] ss:$8 sps:$4 sm:$0xff]   ;;  %v261_v7 = vld [vmem:[#allocation5 + $0x34] ss:$8 sps:$4 sm:$0xff]  }
  0x2a   :  { %162 = vmatprep.subr.bf16.mxu0 %v255_v3  ;;  %v263_v8 = vld [vmem:[#allocation5 + $0x30] ss:$8 sps:$4 sm:$0xff]   ;;  %v264_v9 = vld [vmem:[#allocation5 + $0x44] ss:$8 sps:$4 sm:$0xff]   ;;  %v266_v10 = vld [vmem:[#allocation5 + $0x40] ss:$8 sps:$4 sm:$0xff]  }
  0x2b   :  { %v267_v11 = vld [vmem:[#allocation5 + $0x54] ss:$8 sps:$4 sm:$0xff]   ;;  %v269_v12 = vld [vmem:[#allocation5 + $0x50] ss:$8 sps:$4 sm:$0xff]   ;;  %v270_v13 = vld [vmem:[#allocation5 + $0x64] ss:$8 sps:$4 sm:$0xff]  }
  0x2c   :  { %v272_v14 = vld [vmem:[#allocation5 + $0x60] ss:$8 sps:$4 sm:$0xff]   ;;  %v273_v15 = vld [vmem:[#allocation5 + $0x74] ss:$8 sps:$4 sm:$0xff]   ;;  %v275_v16 = vld [vmem:[#allocation5 + $0x70] ss:$8 sps:$4 sm:$0xff]  }
  0x2d   :  { %163 = vmatpush1.bf16.msra.mxu0 %v257_v4  ;;  %v65_v19 = vshrl.u32 %v64_v18, 7  ;;  %v62_v21 = vld [vmem:[%s420_s2] sm:$0x3]  ;;  %s356_s13 = smov [#allocation7]  }
  0x2e   :  { %164 = vmatprep.subr.bf16.mxu0 %v258_v5  ;;  %s212_s14 = sshll.u32 %s356_s13, 4  ;;  %s213_s14 = int_to_ptr.vmem [resolvable:$true] %s212_s14 }
  0x2f   :  { %v66_v20 = vsub.s32 0, %v65_v19  ;;  %v70_v22 = vsub.s32 1, %v65_v19  ;;  %s321_s15 = scalar_lea.vmem %s213_s14, 512  ;;  %p326_p3 = scmp.lt.s32.totalorder %s213_s14, %s213_s14 }
  0x30   :  { %p322_p2 = scmp.ne.s32.totalorder %s213_s14, %s321_s15  ;;  %p327_p4 = scmp.lt.s32.totalorder %s321_s15, %s321_s15 }
  0x31   :  { %165 = vmatpush1.bf16.msra.mxu0 %v260_v6  ;;  %v67_v23 = vrot.slane %v62_v21, %v66_v20  ;;  %v71_v24 = vrot.slane %v62_v21, %v70_v22 }
  0x32   :  { %166 = vmatprep.subr.bf16.mxu0 %v261_v7  ;;  %p328_p5 = por %p327_p4, %p326_p3 }
  0x34   :  { %p329_p6 = pnand %p328_p5, %p322_p2 }
  0x35   :  { %167 = vmatpush1.bf16.msra.mxu0 %v263_v8 }
  0x36   :  { %168 = vmatprep.subr.bf16.mxu0 %v264_v9 }
  0x39   :  { %169 = vmatpush1.bf16.msra.mxu0 %v266_v10 }
  0x3a   :  { %170 = vmatprep.subr.bf16.mxu0 %v267_v11 }
  0x3d   :  { %171 = vmatpush1.bf16.msra.mxu0 %v269_v12 }
  0x3e   :  { %172 = vmatprep.subr.bf16.mxu0 %v270_v13 }
  0x41   :  { %173 = vmatpush1.bf16.msra.mxu0 %v272_v14 }
  0x42   :  { %174 = vmatprep.subr.bf16.mxu0 %v273_v15 }
  0x45   :  { %175 = vmatpush1.bf16.msra.mxu0 %v275_v16 }
  0x48   :  { %193 = vmatmul.mubr.bf16.vlgmr.msra.gmra.mrb[0].mxu0 %v276_v17 }
 0x11b   :  { %v194_v25 = vpop.f32.mrb[0].mxu0 }
 0x11c   :  { %v195_v26 = vadd.f32 %v194_v25, %v67_v23  ;;  %v196_v27 = vpop.f32.mrb[1].mxu0 }
 0x11d   :  { %v197_v28 = vadd.f32 %v196_v27, %v71_v24  ;;  %v198_v29 = vpop.f32.mrb[2].mxu0 }
 0x11e   :  { %203 = vst [vmem:[#allocation7] sm:$0xff] %v195_v26  ;;  %v199_v30 = vadd.f32 %v198_v29, %v67_v23  ;;  %v200_v31 = vpop.f32.mrb[3].mxu0 }
 0x11f   :  { %204 = vst [vmem:[#allocation7 + $0x8] sm:$0xff] %v197_v28  ;;  %v201_v32 = vadd.f32 %v200_v31, %v71_v24 }
 0x120   :  { %205 = vst [vmem:[#allocation7 + $0x10] sm:$0xff] %v199_v30 }
 0x121   :  { %206 = vst [vmem:[#allocation7 + $0x18] sm:$0xff] %v201_v32 }
 0x122   :  { %332 = shalt.err (!%p329_p6)
}
 0x123   :  { %s333_s17 = scalar_lea.hbm %s421_s3, 512 }
 0x124   :  { %p334_p7 = scmp.ne.s32.totalorder %s421_s3, %s333_s17  ;;  %p337_p8 = scmp.lt.u32.totalorder %s333_s17, %s421_s3 }
 0x126   :  { %p339_p9 = pnand %p337_p8, %p334_p7 }
 0x128   :  { %342 = shalt.err (!%p339_p9)
}
 0x129   :  { %s357_s22 = smov 256   ;;  %s358_s23 = smov 16  }
 0x12a   :  { %218 = dma.vmem_to_hbm [thread:$0]  %s213_s14, 512, %s421_s3, [#allocation4], %s357_s22, %s357_s22, %s358_s23  }
 0x12b   :  { %347 = dma.done.wait [#allocation4], 512  }
 0x12c   :  { %348 = vsyncadd [#allocation4], 4294966784 }
 0x12d   :  { %222 = vsyncpa [#allocation3], 1 }
 0x12e   :  { %223 = vsyncpa [#allocation6], 1 }
 0x12f   :  { %224 = vsyncpa [#allocation4], 1 }

</bundles_post_ra>
